<compile_context>
chip_gen: v6e
topology: v6e:2x2x1
jax: 0.10.0
libtpu: 0.0.40
codegen_flags: <defaults>
</compile_context>

<pallas_src>
import jax
import jax.numpy as jnp
from jax.experimental import pallas as pl
from jax.experimental.pallas import tpu as pltpu


LANE = 128  # TPU lane width; output column dim is padded to a multiple of this.


def gnn_kernel(x_ref, adj_ref, w1_ref, b1_ref, w2_ref, b2_ref, o_ref):
    # x_ref:   (N, B*E)        f32  X with batch folded into the lane axis
    # adj_ref: (N, N)          f32  normalized adjacency Â (f32 for parity)
    # w1_ref:  (B*E, B*H)      bf16 block-diagonal W1
    # b1_ref:  (1, B*H)        f32  b1 tiled over batch
    # w2_ref:  (B*H, PAD_O)    bf16 block-diagonal W2, zero-padded to 128 lanes
    # b2_ref:  (1, PAD_O)      f32  b2 tiled over batch, zero-padded
    # o_ref:   (N, PAD_O)      f32  lane-dense output slab
    adj = adj_ref[...]

    # Layer 1 aggregation: Â @ X for all batch elements in ONE dot (f32).
    ax = jnp.dot(adj, x_ref[...], preferred_element_type=jnp.float32)

    # Layer 1 dense: single bf16 MXU push through block-diagonal W1 (+ b1).
    h1 = jnp.dot(ax.astype(jnp.bfloat16), w1_ref[...],
                 preferred_element_type=jnp.float32) + b1_ref[...]

    # Layer 2 dense: single bf16 push; output lanes already padded to 128.
    hw2 = jnp.dot(h1.astype(jnp.bfloat16), w2_ref[...],
                  preferred_element_type=jnp.float32)

    # Layer 2 aggregation (f32) + bias, one lane-dense store.
    y = jnp.dot(adj, hw2, preferred_element_type=jnp.float32) + b2_ref[...]
    o_ref[...] = y.astype(o_ref.dtype)


def gnn_forward(x, adj_norm, w1, b1, w2, b2):
    B, N, E = x.shape
    H = w1.shape[1]
    O = w2.shape[1]
    BO = B * O
    pad_o = -(-BO // LANE) * LANE  # round up to a lane-dense multiple of 128

    # Fold batch into the lane axis: x_nbe[n, b*E + e] = x[b, n, e].
    x_nbe = jnp.transpose(x, (1, 0, 2)).reshape(N, B * E).astype(jnp.float32)

    # Block-diagonal weights (batch along lanes); weights bf16, biases f32.
    eye_b = jnp.eye(B, dtype=jnp.float32)
    w1_bd = jnp.kron(eye_b, w1).astype(jnp.bfloat16)            # (B*E, B*H)
    b1_t = jnp.tile(b1, B).reshape(1, B * H).astype(jnp.float32)
    w2_bd = jnp.kron(eye_b, w2)                                  # (B*H, B*O)
    w2_pad = jnp.pad(w2_bd, ((0, 0), (0, pad_o - BO))).astype(jnp.bfloat16)
    b2_pad = jnp.pad(jnp.tile(b2, B), (0, pad_o - BO)).reshape(
        1, pad_o).astype(jnp.float32)

    vmem = pl.BlockSpec(memory_space=pltpu.MemorySpace.VMEM)
    out_slab = pl.pallas_call(
        gnn_kernel,
        out_shape=jax.ShapeDtypeStruct((N, pad_o), jnp.float32),
        in_specs=[vmem] * 6,
        out_specs=vmem,
        # TODO(synk): for realistic N (>= a few hundred nodes), tile Â into
        # (tile_N, N) row panels with a reduction grid axis + f32 VMEM
        # accumulator, mark the row-panel axis "parallel" so both v7x
        # TensorCores get work, and budget double-buffered panels against
        # v7x's 64 MiB VMEM with an explicit
        # pltpu.CompilerParams(vmem_limit_bytes=...).
        # TODO(synk): optional exact algebraic fusion (no nonlinearity between
        # layers): precompute Â², W1@W2 and rowsum(Â)⊗(b1@W2) in the wrapper
        # to cut the kernel to 2 dots.
    )(x_nbe, adj_norm.astype(jnp.float32), w1_bd, b1_t, w2_pad, b2_pad)

    # Un-fold the lane-batched output: (N, B*O) -> (B, N, O).
    return jnp.transpose(out_slab[:, :BO].reshape(N, B, O), (1, 0, 2))


def build_normalized_adjacency(edge_index, num_nodes):
    """Dense Â = D^{-1/2} (A + I) D^{-1/2} from edge_index [2, E] (src, dst).

    Uses scatter-add (duplicate edges accumulate) and unconditional self-loops,
    matching torch_geometric GCNConv's gcn_norm for unit edge weights.
    """
    src, dst = edge_index[0], edge_index[1]
    a = jnp.zeros((num_nodes, num_nodes), jnp.float32)
    # messages flow source -> target: Â[dst, src]
    a = a.at[dst, src].add(1.0)
    a = a + jnp.eye(num_nodes, dtype=jnp.float32)       # self-loops
    deg = a.sum(axis=1)
    d_inv_sqrt = jnp.where(deg > 0, 1.0 / jnp.sqrt(deg), 0.0)
    return a * d_inv_sqrt[:, None] * d_inv_sqrt[None, :]


def glorot(key, shape):
    fan_in, fan_out = shape
    limit = jnp.sqrt(6.0 / (fan_in + fan_out))
    return jax.random.uniform(key, shape, jnp.float32, -limit, limit)


if __name__ == "__main__":
    # config: embedding_dim=16, gnn_hidden_dim=32, gnn_out_dim=16
    B, N, E, H, O = 2, 16, 16, 32, 16

    key = jax.random.PRNGKey(0)
    kx, kw1, kb1, kw2, kb2 = jax.random.split(key, 5)

    # deterministic ring graph (both directions) over N nodes
    idx = jnp.arange(N)
    src = jnp.concatenate([idx, (idx + 1) % N])
    dst = jnp.concatenate([(idx + 1) % N, idx])
    edge_index = jnp.stack([src, dst], axis=0).astype(jnp.int32)

    x = jax.random.normal(kx, (B, N, E), jnp.float32)
    w1 = glorot(kw1, (E, H))
    b1 = jax.random.normal(kb1, (H,), jnp.float32) * 0.01
    w2 = glorot(kw2, (H, O))
    b2 = jax.random.normal(kb2, (O,), jnp.float32) * 0.01

    adj_norm = build_normalized_adjacency(edge_index, N)

    out = gnn_forward(x, adj_norm, w1, b1, w2, b2)
    out = jax.block_until_ready(out)

    # reference in plain f32 JAX (kernel uses bf16 weight matmuls with f32
    # accumulation and f32 adjacency dots, hence the loose tolerance)
    h1_ref = jnp.einsum("ij,bjk->bik", adj_norm, x @ w1) + b1
    y_ref = jnp.einsum("ij,bjk->bik", adj_norm, h1_ref @ w2) + b2
    assert out.shape == (B, N, O)
    assert jnp.allclose(out, y_ref, atol=5e-2, rtol=5e-2), (
        float(jnp.max(jnp.abs(out - y_ref))))

    print("KERNEL_OK")
</pallas_src>

<mosaic_0001>
module attributes {stable_mosaic.version = 11 : i64} {
  func.func @gnn_kernel(%arg0: memref<16x32xf32, #tpu.memory_space<vmem>>, %arg1: memref<16x16xf32, #tpu.memory_space<vmem>>, %arg2: memref<32x64xbf16, #tpu.memory_space<vmem>>, %arg3: memref<1x64xf32, #tpu.memory_space<vmem>>, %arg4: memref<64x128xbf16, #tpu.memory_space<vmem>>, %arg5: memref<1x128xf32, #tpu.memory_space<vmem>>, %arg6: memref<16x128xf32, #tpu.memory_space<vmem>>) attributes {dimension_semantics = [], scalar_prefetch = 0 : i64, scratch_operands = 0 : i64, tpu.core_type = #tpu.core_type<tc>} {
    %c0 = arith.constant 0 : index
    %c0_0 = arith.constant 0 : index
    %0 = vector.load %arg1[%c0, %c0_0] : memref<16x16xf32, #tpu.memory_space<vmem>>, vector<16x16xf32>
    %c0_1 = arith.constant 0 : index
    %c0_2 = arith.constant 0 : index
    %1 = vector.load %arg0[%c0_1, %c0_2] : memref<16x32xf32, #tpu.memory_space<vmem>>, vector<16x32xf32>
    %cst = arith.constant dense<0.000000e+00> : vector<16x32xf32>
    %2 = tpu.matmul %0, %1, %cst {dimension_numbers = #tpu.dot_dimension_numbers<[1], [0], [0], [1], [0, 0, 1, 1], [], []>} : vector<16x16xf32>, vector<16x32xf32>, vector<16x32xf32> -> vector<16x32xf32>
    %3 = arith.truncf %2 : vector<16x32xf32> to vector<16x32xbf16>
    %c0_3 = arith.constant 0 : index
    %c0_4 = arith.constant 0 : index
    %4 = vector.load %arg2[%c0_3, %c0_4] : memref<32x64xbf16, #tpu.memory_space<vmem>>, vector<32x64xbf16>
    %cst_5 = arith.constant dense<0.000000e+00> : vector<16x64xf32>
    %5 = tpu.matmul %3, %4, %cst_5 {dimension_numbers = #tpu.dot_dimension_numbers<[1], [0], [0], [1], [0, 0, 1, 1], [], []>} : vector<16x32xbf16>, vector<32x64xbf16>, vector<16x64xf32> -> vector<16x64xf32>
    %c0_6 = arith.constant 0 : index
    %c0_7 = arith.constant 0 : index
    %6 = vector.load %arg3[%c0_6, %c0_7] : memref<1x64xf32, #tpu.memory_space<vmem>>, vector<1x64xf32>
    %7 = vector.broadcast %6 : vector<1x64xf32> to vector<16x64xf32>
    %8 = arith.addf %5, %7 : vector<16x64xf32>
    %9 = arith.truncf %8 : vector<16x64xf32> to vector<16x64xbf16>
    %c0_8 = arith.constant 0 : index
    %c0_9 = arith.constant 0 : index
    %10 = vector.load %arg4[%c0_8, %c0_9] : memref<64x128xbf16, #tpu.memory_space<vmem>>, vector<64x128xbf16>
    %cst_10 = arith.constant dense<0.000000e+00> : vector<16x128xf32>
    %11 = tpu.matmul %9, %10, %cst_10 {dimension_numbers = #tpu.dot_dimension_numbers<[1], [0], [0], [1], [0, 0, 1, 1], [], []>} : vector<16x64xbf16>, vector<64x128xbf16>, vector<16x128xf32> -> vector<16x128xf32>
    %cst_11 = arith.constant dense<0.000000e+00> : vector<16x128xf32>
    %12 = tpu.matmul %0, %11, %cst_11 {dimension_numbers = #tpu.dot_dimension_numbers<[1], [0], [0], [1], [0, 0, 1, 1], [], []>} : vector<16x16xf32>, vector<16x128xf32>, vector<16x128xf32> -> vector<16x128xf32>
    %c0_12 = arith.constant 0 : index
    %c0_13 = arith.constant 0 : index
    %13 = vector.load %arg5[%c0_12, %c0_13] : memref<1x128xf32, #tpu.memory_space<vmem>>, vector<1x128xf32>
    %14 = vector.broadcast %13 : vector<1x128xf32> to vector<16x128xf32>
    %15 = arith.addf %12, %14 : vector<16x128xf32>
    %c0_14 = arith.constant 0 : index
    %c0_15 = arith.constant 0 : index
    %16 = vector.load %arg6[%c0_14, %c0_15] : memref<16x128xf32, #tpu.memory_space<vmem>>, vector<16x128xf32>
    tpu.vector_store %arg6[%c0_14, %c0_15], %15 {strides = array<i32>} : memref<16x128xf32, #tpu.memory_space<vmem>>, vector<16x128xf32>,
    return
  }
}

</mosaic_0001>

<bundles_post_ra>
// kernel: tpu_custom_call.1
= control target key start
LH: loop header
LB: loop body
LE: loop exit
PB: predicated region body
PF: predicated region fallthrough
CT: control target
= control target key end

     0   :  { %11 = vsyncpa [#allocation3], 0  ;;  %s685_s0 = inlined_call_operand.hbm [shape: f32[16,32], index: 0, kind: input, shape index: {}]   ;;  %s686_s1 = inlined_call_operand.hbm [shape: f32[16,16], index: 1, kind: input, shape index: {}]   ;;  %s687_s2 = inlined_call_operand.hbm [shape: bf16[32,64], index: 2, kind: input, shape index: {}]   ;;  %s688_s3 = inlined_call_operand.vmem [shape: f32[1,64], index: 3, kind: input, shape index: {}]   ;;  %s689_s4 = inlined_call_operand.hbm [shape: bf16[64,128], index: 4, kind: input, shape index: {}]   ;;  %s690_s5 = inlined_call_operand.vmem [shape: f32[1,128], index: 5, kind: input, shape index: {}]   ;;  %s691_s6 = inlined_call_operand.hbm [shape: f32[16,128], index: 6, kind: output, shape index: {}]  }
   0x1   :  { %12 = vsyncpa [#allocation6], 0 }
   0x2   :  { %13 = vsyncpa [#allocation9], 0 }
   0x3   :  { %14 = vsyncpa [#allocation4], 0  ;;  %s605_s21 = smov [#allocation5]   ;;  %s606_s23 = smov [#allocation2]  }
   0x4   :  { %s32_s22 = sshll.u32 %s605_s21, 4  ;;  %s20_s24 = sshll.u32 %s606_s23, 4  ;;  %s33_s22 = int_to_ptr.vmem [resolvable:$true] %s32_s22  ;;  %s21_s24 = int_to_ptr.vmem [resolvable:$true] %s20_s24 }
   0x5   :  { %s505_s25 = scalar_lea.vmem %s33_s22, 256  ;;  %p510_p1 = scmp.lt.s32.totalorder %s33_s22, %s33_s22 }
   0x6   :  { %p506_p0 = scmp.ne.s32.totalorder %s33_s22, %s505_s25  ;;  %p511_p2 = scmp.lt.s32.totalorder %s505_s25, %s505_s25 }
   0x8   :  { %p512_p3 = por %p511_p2, %p510_p1 }
   0xa   :  { %p513_p4 = pnand %p512_p3, %p506_p0 }
   0xc   :  { %516 = shalt.err (!%p513_p4)
}
   0xd   :  { %s607_s26 = smov 128   ;;  %s608_s27 = smov 8  }
   0xe   :  { %38 = dma.hbm_to_vmem [thread:$0]  %s686_s1, 256, %s33_s22, [#allocation6], %s607_s26, %s607_s26, %s608_s27  }
   0xf   :  { %s525_s30 = scalar_lea.vmem %s21_s24, 256  ;;  %p530_p6 = scmp.lt.s32.totalorder %s21_s24, %s21_s24 }
  0x10   :  { %p526_p5 = scmp.ne.s32.totalorder %s21_s24, %s525_s30  ;;  %p531_p7 = scmp.lt.s32.totalorder %s525_s30, %s525_s30 }
  0x12   :  { %p532_p8 = por %p531_p7, %p530_p6 }
  0x14   :  { %p533_p9 = pnand %p532_p8, %p526_p5 }
  0x16   :  { %536 = shalt.err (!%p533_p9)
}
  0x17   :  { %26 = dma.hbm_to_vmem [thread:$0]  %s685_s0, 256, %s21_s24, [#allocation3], %s607_s26, %s607_s26, %s608_s27  }
  0x18   :  { %s609_s9 = smov [#allocation7]  }
  0x19   :  { %s44_s10 = sshll.u32 %s609_s9, 4  ;;  %s45_s10 = int_to_ptr.vmem [resolvable:$true] %s44_s10 }
  0x1a   :  { %s545_s11 = scalar_lea.vmem %s45_s10, 256  ;;  %p550_p11 = scmp.lt.s32.totalorder %s45_s10, %s45_s10 }
  0x1b   :  { %p546_p10 = scmp.ne.s32.totalorder %s45_s10, %s545_s11  ;;  %p551_p12 = scmp.lt.s32.totalorder %s545_s11, %s545_s11 }
  0x1d   :  { %p552_p13 = por %p551_p12, %p550_p11 }
  0x1f   :  { %p553_p0 = pnand %p552_p13, %p546_p10 }
  0x21   :  { %556 = shalt.err (!%p553_p0)
}
  0x22   :  { %s610_s1 = smov 64   ;;  %s611_s12 = smov 4  }
  0x23   :  { %50 = dma.hbm_to_vmem [thread:$0]  %s687_s2, 256, %s45_s10, [#allocation6], %s610_s1, %s610_s1, %s611_s12  }
  0x24   :  { %s612_s15 = smov [#allocation8]  }
  0x25   :  { %s58_s16 = sshll.u32 %s612_s15, 4  ;;  %s59_s16 = int_to_ptr.vmem [resolvable:$true] %s58_s16 }
  0x26   :  { %s565_s0 = scalar_lea.vmem %s59_s16, 512  ;;  %p570_p2 = scmp.lt.s32.totalorder %s59_s16, %s59_s16 }
  0x27   :  { %p566_p1 = scmp.ne.s32.totalorder %s59_s16, %s565_s0  ;;  %p571_p3 = scmp.lt.s32.totalorder %s565_s0, %s565_s0 }
  0x29   :  { %p572_p4 = por %p571_p3, %p570_p2 }
  0x2b   :  { %p573_p5 = pnand %p572_p4, %p566_p1 }
  0x2d   :  { %576 = shalt.err (!%p573_p5)
}
  0x2e   :  { %64 = dma.hbm_to_vmem [thread:$0]  %s689_s4, 512, %s59_s16, [#allocation9], %s610_s1, %s610_s1, %s611_s12  }
  0x2f   :  { %597 = dma.done.wait [#allocation3], 256  }
  0x30   :  { %598 = vsyncadd [#allocation3], 4294967040 }
  0x31   :  { %599 = dma.done.wait [#allocation6], 512  }
  0x32   :  { %600 = vsyncadd [#allocation6], 4294966784 }
  0x33   :  { %601 = dma.done.wait [#allocation9], 512  }
  0x34   :  { %602 = vsyncadd [#allocation9], 4294966784  ;;  %v613_v0 = vmov 0.0   ;;  %vm84_vm0 = vcmask 130048   ;;  %v83_v1 = vld [vmem:[#allocation2 + $0x8] sm:$0xff]  ;;  %v82_v2 = vld [vmem:[#allocation2] sm:$0xff] }
  0x35   :  { %461 = vmatprep.subr.bf16.mxu0 %v613_v0  ;;  %v80_v3 = vld [vmem:[#allocation5] sm:$0xff]  ;;  %446 = vmatprep.subr.mxu1 %v83_v1  ;;  %v81_v4 = vld [vmem:[#allocation5 + $0x8] sm:$0xff]  ;;  %v491_v5 = vld [vmem:[#allocation7 + $0x8] sm:$0xff]   ;;  %vm614_vm1 = vmmov 0   ;;  %vm190_vm2 = vcmask 261120   ;;  %vm268_vm3 = vcmask 523264  }
  0x36   :  { %450 = vmatprep.mubr.msk.f32.mxu1 %vm84_vm0, %v80_v3  ;;  %447 = vmatpush3.msra.mxu1 %v83_v1  ;;  %v492_v6 = vld [vmem:[#allocation7] sm:$0xff]   ;;  %v493_v7 = vld [vmem:[#allocation8 + $0x18] sm:$0xff]   ;;  %v495_v12 = vld [vmem:[#allocation8 + $0x8] sm:$0xff]   ;;  %s615_s20 = smov [#allocation10]  }
  0x37   :  { %448 = vmatprep.subr.mxu1 %v82_v2  ;;  %469 = vmatprep.mubr.msk.bf16.mxu0 %vm614_vm1, %v613_v0  ;;  %v494_v8 = vld [vmem:[#allocation8 + $0x10] sm:$0xff]   ;;  %v496_v13 = vld [vmem:[#allocation8] sm:$0xff]   ;;  %s402_s21 = sshll.u32 %s615_s20, 4  ;;  %s403_s21 = int_to_ptr.vmem [resolvable:$true] %s402_s21 }
  0x38   :  { %449 = vmatpush3.msra.mxu1 %v82_v2  ;;  %462 = vmatpush3.bf16.msra.mxu0 %v493_v7  ;;  %v418_v15 = vld [vmem:[%s688_s3] ss:$0 sm:$0xff]  ;;  %s577_s22 = scalar_lea.vmem %s403_s21, 256  ;;  %p582_p7 = scmp.lt.s32.totalorder %s403_s21, %s403_s21 }
  0x39   :  { %451 = vmatmul.mubr.msk.f32.vlgmr.msra.gmra.mxu1 %vm84_vm0, %v81_v4  ;;  %453 = vmatprep.subr.bf16.mxu1 %v613_v0  ;;  %v427_v26 = vld [vmem:[%s690_s5] ss:$0 sm:$0xff]  ;;  %p578_p6 = scmp.ne.s32.totalorder %s403_s21, %s577_s22  ;;  %p583_p8 = scmp.lt.s32.totalorder %s577_s22, %s577_s22 }
  0x3a   :  { %454 = vmatpush3.bf16.msra.mxu1 %v491_v5  ;;  %457 = vmatprep.mubr.msk.bf16.mxu1 %vm614_vm1, %v613_v0 }
  0x3b   :  { %455 = vmatprep.subr.bf16.mxu1 %v613_v0  ;;  %463 = vmatprep.subr.bf16.mxu0 %v613_v0  ;;  %p584_p9 = por %p583_p8, %p582_p7 }
  0x3c   :  { %464 = vmatpush3.bf16.msra.mxu0 %v494_v8 }
  0x3d   :  { %465 = vmatprep.subr.bf16.mxu0 %v613_v0  ;;  %p585_p10 = pnand %p584_p9, %p578_p6 }
  0x3e   :  { %456 = vmatpush3.bf16.msra.mxu1 %v492_v6 }
  0x40   :  { %466 = vmatpush3.bf16.msra.mxu0 %v495_v12 }
  0x41   :  { %467 = vmatprep.subr.bf16.mxu0 %v613_v0 }
  0x44   :  { %468 = vmatpush3.bf16.msra.mxu0 %v496_v13 }
  0xf9   :  { %v452_v9 = vpop.f32.mrf.mxu1 }
  0xfb   :  { %v157_v10 = vpop.f32.mrf.mxu1 }
  0xfc   :  { %v166_v11 = vpack.c.bf16 %v452_v9, %v157_v10 }
  0xfe   :  { %458 = vmatmul.mubr.msk.bf16.vlgmr.msra.gmra.mxu1 %vm190_vm2, %v166_v11 }
  0xff   :  { %477 = vmatprep.mubr.msk.f32.mxu1 %vm84_vm0, %v80_v3 }
 0x1be   :  { %v228_v14 = vpop.f32.mrf.mxu1 }
 0x1bf   :  { %v229_v18 = vadd.f32 %v418_v15, %v228_v14 }
 0x1c0   :  { %v459_v16 = vpop.f32.mrf.mxu1 }
 0x1c2   :  { %v231_v17 = vpop.f32.mrf.mxu1 }
 0x1c3   :  { %v232_v19 = vadd.f32 %v418_v15, %v231_v17 }
 0x1c4   :  { %v460_v20 = vpop.f32.mrf.mxu1 }
 0x1c5   :  { %v235_v21 = vpack.c.bf16 %v232_v19, %v229_v18 }
 0x1c7   :  { %470 = vmatmul.mubr.msk.bf16.vlgmr.msra.gmra.mxu0 %vm268_vm3, %v235_v21 }
 0x287   :  { %v306_v22 = vpop.f32.mrf.mxu0 }
 0x289   :  { %v471_v23 = vpop.f32.mrf.mxu0 }
 0x28b   :  { %v309_v24 = vpop.f32.mrf.mxu0 }
 0x28c   :  { %473 = vmatprep.subr.mxu1 %v309_v24 }
 0x28d   :  { %v472_v25 = vpop.f32.mrf.mxu0  ;;  %474 = vmatpush3.msra.mxu1 %v309_v24 }
 0x28e   :  { %475 = vmatprep.subr.mxu1 %v306_v22 }
 0x28f   :  { %476 = vmatpush3.msra.mxu1 %v306_v22 }
 0x290   :  { %478 = vmatmul.mubr.msk.f32.vlgmr.msra.gmra.mxu1 %vm84_vm0, %v81_v4 }
 0x350   :  { %v479_v27 = vpop.f32.mrf.mxu1 }
 0x351   :  { %v392_v28 = vadd.f32 %v479_v27, %v427_v26 }
 0x352   :  { %v386_v29 = vpop.f32.mrf.mxu1 }
 0x353   :  { %396 = vst [vmem:[#allocation10 + $0x8] sm:$0xff] %v392_v28  ;;  %v387_v30 = vadd.f32 %v427_v26, %v386_v29 }
 0x355   :  { %395 = vst [vmem:[#allocation10] sm:$0xff] %v387_v30 }
 0x356   :  { %588 = shalt.err (!%p585_p10)
}
 0x357   :  { %408 = dma.vmem_to_hbm [thread:$0]  %s403_s21, 256, %s691_s6, [#allocation4], %s607_s26, %s607_s26, %s608_s27  }
 0x358   :  { %603 = dma.done.wait [#allocation4], 256  }
 0x359   :  { %604 = vsyncadd [#allocation4], 4294967040 }
 0x35a   :  { %412 = vsyncpa [#allocation3], 1 }
 0x35b   :  { %413 = vsyncpa [#allocation6], 1 }
 0x35c   :  { %414 = vsyncpa [#allocation9], 1 }
 0x35d   :  { %415 = vsyncpa [#allocation4], 1 }

</bundles_post_ra>
